<compile_context>
chip_gen: v5e
topology: v5e:2x2
jax: 0.10.0
libtpu: 0.0.40
codegen_flags: <defaults>
</compile_context>

<pallas_src>
import functools

import jax
import jax.numpy as jnp
from jax.experimental import pallas as pl
from jax.experimental.pallas import tpu as pltpu


def _edge_mlp_kernel(idx_ref, e_ref, x_ref, w_ref, b_ref, o_ref, *,
                     num_linear, n_nodes):
    """One (batch, edge-tile) grid step of the fused EdgeModel MLP.

    idx_ref: [tile_e, 2] int32         per-edge (src, dest) node ids
    e_ref:   [1, tile_e, H]            edge features
    x_ref:   [1, n_nodes, H]           node features of this batch element
    w_ref:   [num_linear + 2, H, H]    stacked weights:
             [0]=W0[:H] (edge_attr), [1]=W0[H:2H] (src), [2]=W0[2H:] (dest),
             [3:]=W1..W_{L-1}
    b_ref:   [num_linear, H]           stacked biases
    o_ref:   [1, tile_e, H]            output edge features
    """
    f32 = jnp.float32
    e_blk = e_ref[0]                         # [tile_e, H]
    x_nodes = x_ref[0]                       # [n_nodes, H]
    tile_e = e_blk.shape[0]

    # Per-node features pre-multiplied by the src / dest slices of W0 (tiny,
    # [n_nodes, H]); MXU-native in the storage dtype, f32 accumulation.
    ys = jnp.dot(x_nodes, w_ref[1], preferred_element_type=f32)
    yd = jnp.dot(x_nodes, w_ref[2], preferred_element_type=f32)

    # Fused gather: one-hot(endpoint id) @ per-node features on the MXU
    # (no src/dest rows ever touch HBM).
    idx = idx_ref[...]                                             # [tile_e, 2]
    node_iota = jax.lax.broadcasted_iota(jnp.int32, (tile_e, n_nodes), 1)
    oh_src = (node_iota == idx[:, 0:1]).astype(f32)                # [tile_e, n_nodes]
    oh_dst = (node_iota == idx[:, 1:2]).astype(f32)

    # Layer 0: cat([edge_attr, x[src], x[dest]]) @ W0 + b0 with the concat and
    # gather fused (three partial-sum matmuls into one f32 accumulator).
    h = jnp.dot(e_blk, w_ref[0], preferred_element_type=f32)
    h = h + jnp.dot(oh_src, ys, preferred_element_type=f32)
    h = h + jnp.dot(oh_dst, yd, preferred_element_type=f32)
    h = h + b_ref[0:1, :].astype(f32)
    if num_linear > 1:
        h = h * jax.nn.sigmoid(h)            # SiLU (f32)

    # Layers 1..L-1: h stays f32 throughout; upcast the tiny weights instead.
    for l in range(1, num_linear):
        w = w_ref[2 + l].astype(f32)
        h = jnp.dot(h, w, preferred_element_type=f32)
        h = h + b_ref[l:l + 1, :].astype(f32)
        if l != num_linear - 1:              # SiLU between layers, not after last
            h = h * jax.nn.sigmoid(h)

    o_ref[0] = h.astype(o_ref.dtype)


def edge_model_forward(x, edge_index, edge_attr, params, *, tile_e=None):
    """Fused EdgeModel forward (gather + concat + MLP in one kernel).

    x:          [B, n_nodes, H]
    edge_index: [2, E] int
    edge_attr:  [B, E, H]  (same dtype as x)
    params:     list of (W, b); W0: [3H, H], subsequent layers: [H, H]
    Returns:    [B, E, H]
    """
    B, n_nodes, H = x.shape
    Be, E, He = edge_attr.shape
    assert Be == B and He == H
    assert edge_index.shape == (2, E)
    dtype = edge_attr.dtype

    num_linear = len(params)
    w0, _ = params[0]
    assert w0.shape == (3 * H, H), "EdgeModel layer 0 must be (3*H -> H)"
    for (w, b) in params[1:]:
        assert w.shape == (H, H) and b.shape == (H,), \
            "hidden/output widths must equal hidden_channels"

    # Consolidated parameter operands (2 inputs instead of ~2*num_linear).
    w_stack = jnp.stack([w0[:H], w0[H:2 * H], w0[2 * H:]] +
                        [w for (w, _b) in params[1:]]).astype(dtype)
    b_stack = jnp.stack([b for (_w, b) in params]).astype(dtype)

    # Endpoint ids, edge-major so each edge's (src, dest) sits on the sublane
    # of its own row inside the kernel block.
    idx2 = edge_index.T.astype(jnp.int32)                          # [E, 2]

    # Edge tile: large (amortizes ~0.35us per grid step), shrunk only to keep
    # >= ~8 grid steps so pipelining / v7x megacore have work.
    if tile_e is None:
        tile_e = 8192
        while B * pl.cdiv(E, tile_e) < 8 and tile_e > 1024:
            tile_e //= 2
        if tile_e >= E:
            tile_e = E                       # single full block along edges
    grid_e = pl.cdiv(E, tile_e)              # ragged tail handled by Pallas

    # Explicit VMEM budget: double-buffered blocks + headroom for the f32
    # intermediates (everything below H=32 lanes pads to 128 lanes in VMEM).
    item = jnp.dtype(dtype).itemsize
    pipeline_bytes = 2 * (tile_e * H * item          # edge_attr in
                          + tile_e * H * item        # out
                          + tile_e * 128 * 4         # endpoint ids (lane-padded)
                          + n_nodes * H * item)      # node table
    scratch_bytes = 8 * tile_e * 128 * 4             # f32 intermediates, padded
    vmem_limit = int(min(48 * 1024 * 1024,
                         max(32 * 1024 * 1024, pipeline_bytes + scratch_bytes)))

    # Advisory cost estimate for the XLA scheduler.
    flops = 2 * B * E * H * (3 * H + 2 * n_nodes + (num_linear - 1) * H)
    transcendentals = B * E * H * (num_linear - 1)
    bytes_accessed = (item * B * E * 2 * H            # edge_attr in + out
                      + E * 8                         # endpoint ids
                      + item * B * n_nodes * H        # node table
                      + item * (int(w_stack.size) + int(b_stack.size)))

    # TODO(synk): for very large n_nodes the whole-x VMEM block and the
    # one-hot gather do not fit; that regime needs a DMA-gather fallback.
    kernel = functools.partial(_edge_mlp_kernel, num_linear=num_linear,
                               n_nodes=n_nodes)

    out = pl.pallas_call(
        kernel,
        out_shape=jax.ShapeDtypeStruct((B, E, H), dtype),
        grid_spec=pltpu.PrefetchScalarGridSpec(
            num_scalar_prefetch=0,
            grid=(B, grid_e),
            in_specs=[
                pl.BlockSpec((tile_e, 2), lambda b, i: (i, 0)),        # endpoint ids
                pl.BlockSpec((1, tile_e, H), lambda b, i: (b, i, 0)),  # edge_attr
                pl.BlockSpec((1, n_nodes, H), lambda b, i: (b, 0, 0)),  # node features
                pl.BlockSpec(w_stack.shape, lambda b, i: (0, 0, 0)),   # weights
                pl.BlockSpec(b_stack.shape, lambda b, i: (0, 0)),      # biases
            ],
            out_specs=pl.BlockSpec((1, tile_e, H), lambda b, i: (b, i, 0)),
        ),
        compiler_params=pltpu.CompilerParams(
            dimension_semantics=("parallel", "parallel"),
            vmem_limit_bytes=vmem_limit),
        cost_estimate=pl.CostEstimate(
            flops=flops,
            transcendentals=transcendentals,
            bytes_accessed=bytes_accessed),
    )(idx2, edge_attr, x, w_stack, b_stack)
    return out


def mp_layer_forward(x, edge_index, edge_attr, edge_params):
    """MPLayer.forward: fused endpoint gather + EdgeModel MLP kernel.

    x:          [B, n_nodes, H]
    edge_index: [2, n_edges] int32
    edge_attr:  [B, n_edges, H]
    Returns (x, new_edge_attr).
    """
    new_edge_attr = edge_model_forward(x, edge_index, edge_attr, edge_params)
    # TODO(synk): node_model is None in the provided MPLayer; x passes through.
    return x, new_edge_attr


def init_edge_model_params(key, mlp_layers, hidden_channels, dtype=jnp.float32):
    """Linear layers: (3H -> H), (mlp_layers - 2) x (H -> H), (H -> H)."""
    dims = [3 * hidden_channels, hidden_channels]
    for _ in range(mlp_layers - 2):
        dims.append(hidden_channels)
    dims.append(hidden_channels)

    params = []
    for l in range(len(dims) - 1):
        in_ch, out_ch = dims[l], dims[l + 1]
        key, kw, kb = jax.random.split(key, 3)
        bound = 1.0 / jnp.sqrt(in_ch)
        w = jax.random.uniform(kw, (in_ch, out_ch), dtype, -bound, bound)
        b = jax.random.uniform(kb, (out_ch,), dtype, -bound, bound)
        params.append((w, b))
    return params


def _reference_forward(src, dest, edge_attr, params):
    hp = jax.lax.Precision.HIGHEST
    h = jnp.concatenate([edge_attr, src, dest], axis=2)
    num_linear = len(params)
    for l, (w, b) in enumerate(params):
        h = jnp.matmul(h, w, precision=hp) + b
        if l != num_linear - 1:
            h = h * jax.nn.sigmoid(h)
    return h


if __name__ == "__main__":
    mlp_layers = 3
    hidden_channels = 32
    batch = 2          # "batch_size - 1" in the original docstring
    n_nodes = 8
    n_edges = 8

    key = jax.random.PRNGKey(0)
    kx, ke, ki, kp = jax.random.split(key, 4)
    x = jax.random.normal(kx, (batch, n_nodes, hidden_channels), jnp.float32)
    edge_attr = jax.random.normal(ke, (batch, n_edges, hidden_channels), jnp.float32)
    edge_index = jax.random.randint(ki, (2, n_edges), 0, n_nodes, dtype=jnp.int32)

    params = init_edge_model_params(kp, mlp_layers, hidden_channels)

    # f32 path
    x_out, edge_out = mp_layer_forward(x, edge_index, edge_attr, params)
    x_out = jax.block_until_ready(x_out)
    edge_out = jax.block_until_ready(edge_out)

    src = jnp.take(x, edge_index[0], axis=1)
    dest = jnp.take(x, edge_index[1], axis=1)
    ref = _reference_forward(src, dest, edge_attr, params)
    assert edge_out.shape == (batch, n_edges, hidden_channels)
    assert jnp.allclose(edge_out, ref, atol=5e-5, rtol=5e-5), \
        float(jnp.max(jnp.abs(edge_out - ref)))
    assert jnp.array_equal(x_out, x)

    # bf16 storage path (halves HBM traffic; f32 accumulation + f32 intermediate h).
    x_bf = x.astype(jnp.bfloat16)
    e_bf = edge_attr.astype(jnp.bfloat16)
    p_bf = [(w.astype(jnp.bfloat16), b.astype(jnp.bfloat16)) for (w, b) in params]
    _, edge_out_bf = mp_layer_forward(x_bf, edge_index, e_bf, p_bf)
    edge_out_bf = jax.block_until_ready(edge_out_bf)
    ref_bf = _reference_forward(
        jnp.take(x_bf, edge_index[0], axis=1).astype(jnp.float32),
        jnp.take(x_bf, edge_index[1], axis=1).astype(jnp.float32),
        e_bf.astype(jnp.float32),
        [(w.astype(jnp.float32), b.astype(jnp.float32)) for (w, b) in p_bf])
    assert jnp.allclose(edge_out_bf.astype(jnp.float32), ref_bf,
                        atol=2e-2, rtol=2e-2), \
        float(jnp.max(jnp.abs(edge_out_bf.astype(jnp.float32) - ref_bf)))

    print("KERNEL_OK")
</pallas_src>

<mosaic_0001>
module attributes {stable_mosaic.version = 11 : i64} {
  func.func @_edge_mlp_kernel(%arg0: i32, %arg1: i32, %arg2: memref<8x2xi32, #tpu.memory_space<vmem>>, %arg3: memref<1x8x32xf32, #tpu.memory_space<vmem>>, %arg4: memref<1x8x32xf32, #tpu.memory_space<vmem>>, %arg5: memref<5x32x32xf32, #tpu.memory_space<vmem>>, %arg6: memref<3x32xf32, #tpu.memory_space<vmem>>, %arg7: memref<1x8x32xf32, #tpu.memory_space<vmem>>) attributes {dimension_semantics = [#tpu.dimension_semantics<parallel>, #tpu.dimension_semantics<parallel>], iteration_bounds = array<i64: 2, 1>, scalar_prefetch = 0 : i64, scratch_operands = 0 : i64, tpu.core_type = #tpu.core_type<tc>, window_params = [{transform_indices = @transform_0, window_bounds = array<i64: 8, 2>}, {transform_indices = @transform_1, window_bounds = array<i64: 1, 8, 32>}, {transform_indices = @transform_2, window_bounds = array<i64: 1, 8, 32>}, {pipeline_mode = #tpu.pipeline_mode<synchronous>, transform_indices = @transform_3, window_bounds = array<i64: 5, 32, 32>}, {pipeline_mode = #tpu.pipeline_mode<synchronous>, transform_indices = @transform_4, window_bounds = array<i64: 3, 32>}, {transform_indices = @transform_5, window_bounds = array<i64: 1, 8, 32>}]} {
    %c0 = arith.constant 0 : index
    %c0_0 = arith.constant 0 : index
    %c0_1 = arith.constant 0 : index
    %0 = vector.load %arg3[%c0, %c0_0, %c0_1] : memref<1x8x32xf32, #tpu.memory_space<vmem>>, vector<1x8x32xf32>
    %1 = vector.shape_cast %0 : vector<1x8x32xf32> to vector<8x32xf32>
    %c0_2 = arith.constant 0 : index
    %c0_3 = arith.constant 0 : index
    %c0_4 = arith.constant 0 : index
    %2 = vector.load %arg4[%c0_2, %c0_3, %c0_4] : memref<1x8x32xf32, #tpu.memory_space<vmem>>, vector<1x8x32xf32>
    %3 = vector.shape_cast %2 : vector<1x8x32xf32> to vector<8x32xf32>
    %c1 = arith.constant 1 : index
    %c0_5 = arith.constant 0 : index
    %c0_6 = arith.constant 0 : index
    %4 = vector.load %arg5[%c1, %c0_5, %c0_6] : memref<5x32x32xf32, #tpu.memory_space<vmem>>, vector<1x32x32xf32>
    %5 = vector.shape_cast %4 : vector<1x32x32xf32> to vector<32x32xf32>
    %cst = arith.constant dense<0.000000e+00> : vector<8x32xf32>
    %6 = tpu.matmul %3, %5, %cst {dimension_numbers = #tpu.dot_dimension_numbers<[1], [0], [0], [1], [0, 0, 1, 1], [], []>} : vector<8x32xf32>, vector<32x32xf32>, vector<8x32xf32> -> vector<8x32xf32>
    %c2 = arith.constant 2 : index
    %c0_7 = arith.constant 0 : index
    %c0_8 = arith.constant 0 : index
    %7 = vector.load %arg5[%c2, %c0_7, %c0_8] : memref<5x32x32xf32, #tpu.memory_space<vmem>>, vector<1x32x32xf32>
    %8 = vector.shape_cast %7 : vector<1x32x32xf32> to vector<32x32xf32>
    %cst_9 = arith.constant dense<0.000000e+00> : vector<8x32xf32>
    %9 = tpu.matmul %3, %8, %cst_9 {dimension_numbers = #tpu.dot_dimension_numbers<[1], [0], [0], [1], [0, 0, 1, 1], [], []>} : vector<8x32xf32>, vector<32x32xf32>, vector<8x32xf32> -> vector<8x32xf32>
    %c0_10 = arith.constant 0 : index
    %c0_11 = arith.constant 0 : index
    %10 = vector.load %arg2[%c0_10, %c0_11] : memref<8x2xi32, #tpu.memory_space<vmem>>, vector<8x2xi32>
    %11 = tpu.iota {dimensions = array<i32: 1>} : vector<8x8xi32>
    %12 = vector.extract_strided_slice %10 {offsets = [0, 0], sizes = [8, 1], strides = [1, 1]} : vector<8x2xi32> to vector<8x1xi32>
    %13 = vector.broadcast %12 : vector<8x1xi32> to vector<8x8xi32>
    %14 = arith.cmpi eq, %11, %13 : vector<8x8xi32>
    %15 = arith.extui %14 : vector<8x8xi1> to vector<8x8xi32>
    %16 = arith.sitofp %15 : vector<8x8xi32> to vector<8x8xf32>
    %17 = vector.extract_strided_slice %10 {offsets = [0, 1], sizes = [8, 1], strides = [1, 1]} : vector<8x2xi32> to vector<8x1xi32>
    %18 = vector.broadcast %17 : vector<8x1xi32> to vector<8x8xi32>
    %19 = arith.cmpi eq, %11, %18 : vector<8x8xi32>
    %20 = arith.extui %19 : vector<8x8xi1> to vector<8x8xi32>
    %21 = arith.sitofp %20 : vector<8x8xi32> to vector<8x8xf32>
    %c0_12 = arith.constant 0 : index
    %c0_13 = arith.constant 0 : index
    %c0_14 = arith.constant 0 : index
    %22 = vector.load %arg5[%c0_12, %c0_13, %c0_14] : memref<5x32x32xf32, #tpu.memory_space<vmem>>, vector<1x32x32xf32>
    %23 = vector.shape_cast %22 : vector<1x32x32xf32> to vector<32x32xf32>
    %cst_15 = arith.constant dense<0.000000e+00> : vector<8x32xf32>
    %24 = tpu.matmul %1, %23, %cst_15 {dimension_numbers = #tpu.dot_dimension_numbers<[1], [0], [0], [1], [0, 0, 1, 1], [], []>} : vector<8x32xf32>, vector<32x32xf32>, vector<8x32xf32> -> vector<8x32xf32>
    %cst_16 = arith.constant dense<0.000000e+00> : vector<8x32xf32>
    %25 = tpu.matmul %16, %6, %cst_16 {dimension_numbers = #tpu.dot_dimension_numbers<[1], [0], [0], [1], [0, 0, 1, 1], [], []>} : vector<8x8xf32>, vector<8x32xf32>, vector<8x32xf32> -> vector<8x32xf32>
    %26 = arith.addf %24, %25 : vector<8x32xf32>
    %cst_17 = arith.constant dense<0.000000e+00> : vector<8x32xf32>
    %27 = tpu.matmul %21, %9, %cst_17 {dimension_numbers = #tpu.dot_dimension_numbers<[1], [0], [0], [1], [0, 0, 1, 1], [], []>} : vector<8x8xf32>, vector<8x32xf32>, vector<8x32xf32> -> vector<8x32xf32>
    %28 = arith.addf %26, %27 : vector<8x32xf32>
    %c0_18 = arith.constant 0 : index
    %c0_19 = arith.constant 0 : index
    %29 = vector.load %arg6[%c0_18, %c0_19] : memref<3x32xf32, #tpu.memory_space<vmem>>, vector<1x32xf32>
    %30 = vector.broadcast %29 : vector<1x32xf32> to vector<8x32xf32>
    %31 = arith.addf %28, %30 : vector<8x32xf32>
    %32 = arith.negf %31 : vector<8x32xf32>
    %33 = math.exp %32 : vector<8x32xf32>
    %cst_20 = arith.constant 1.000000e+00 : f32
    %34 = vector.broadcast %cst_20 : f32 to vector<8x32xf32>
    %35 = arith.addf %34, %33 : vector<8x32xf32>
    %36 = arith.divf %34, %35 : vector<8x32xf32>
    %37 = arith.mulf %31, %36 : vector<8x32xf32>
    %c3 = arith.constant 3 : index
    %c0_21 = arith.constant 0 : index
    %c0_22 = arith.constant 0 : index
    %38 = vector.load %arg5[%c3, %c0_21, %c0_22] : memref<5x32x32xf32, #tpu.memory_space<vmem>>, vector<1x32x32xf32>
    %39 = vector.shape_cast %38 : vector<1x32x32xf32> to vector<32x32xf32>
    %cst_23 = arith.constant dense<0.000000e+00> : vector<8x32xf32>
    %40 = tpu.matmul %37, %39, %cst_23 {dimension_numbers = #tpu.dot_dimension_numbers<[1], [0], [0], [1], [0, 0, 1, 1], [], []>} : vector<8x32xf32>, vector<32x32xf32>, vector<8x32xf32> -> vector<8x32xf32>
    %c1_24 = arith.constant 1 : index
    %c0_25 = arith.constant 0 : index
    %41 = vector.load %arg6[%c1_24, %c0_25] : memref<3x32xf32, #tpu.memory_space<vmem>>, vector<1x32xf32>
    %42 = vector.broadcast %41 : vector<1x32xf32> to vector<8x32xf32>
    %43 = arith.addf %40, %42 : vector<8x32xf32>
    %44 = arith.negf %43 : vector<8x32xf32>
    %45 = math.exp %44 : vector<8x32xf32>
    %cst_26 = arith.constant 1.000000e+00 : f32
    %46 = vector.broadcast %cst_26 : f32 to vector<8x32xf32>
    %47 = arith.addf %46, %45 : vector<8x32xf32>
    %48 = arith.divf %46, %47 : vector<8x32xf32>
    %49 = arith.mulf %43, %48 : vector<8x32xf32>
    %c4 = arith.constant 4 : index
    %c0_27 = arith.constant 0 : index
    %c0_28 = arith.constant 0 : index
    %50 = vector.load %arg5[%c4, %c0_27, %c0_28] : memref<5x32x32xf32, #tpu.memory_space<vmem>>, vector<1x32x32xf32>
    %51 = vector.shape_cast %50 : vector<1x32x32xf32> to vector<32x32xf32>
    %cst_29 = arith.constant dense<0.000000e+00> : vector<8x32xf32>
    %52 = tpu.matmul %49, %51, %cst_29 {dimension_numbers = #tpu.dot_dimension_numbers<[1], [0], [0], [1], [0, 0, 1, 1], [], []>} : vector<8x32xf32>, vector<32x32xf32>, vector<8x32xf32> -> vector<8x32xf32>
    %c2_30 = arith.constant 2 : index
    %c0_31 = arith.constant 0 : index
    %53 = vector.load %arg6[%c2_30, %c0_31] : memref<3x32xf32, #tpu.memory_space<vmem>>, vector<1x32xf32>
    %54 = vector.broadcast %53 : vector<1x32xf32> to vector<8x32xf32>
    %55 = arith.addf %52, %54 : vector<8x32xf32>
    %c0_32 = arith.constant 0 : index
    %c0_33 = arith.constant 0 : index
    %c0_34 = arith.constant 0 : index
    %56 = vector.load %arg7[%c0_32, %c0_33, %c0_34] : memref<1x8x32xf32, #tpu.memory_space<vmem>>, vector<1x8x32xf32>
    %57 = vector.shape_cast %56 : vector<1x8x32xf32> to vector<8x32xf32>
    %58 = vector.shape_cast %55 : vector<8x32xf32> to vector<1x8x32xf32>
    tpu.vector_store %arg7[%c0_32, %c0_33, %c0_34], %58 {strides = array<i32>} : memref<1x8x32xf32, #tpu.memory_space<vmem>>, vector<1x8x32xf32>,
    return
  }
  func.func @transform_0(%arg0: i32, %arg1: i32) -> (i32, i32) {
    %c0_i32 = arith.constant 0 : i32
    %c0_i32_0 = arith.constant 0 : i32
    return %arg1, %c0_i32 : i32, i32
  }
  func.func @transform_1(%arg0: i32, %arg1: i32) -> (i32, i32, i32) {
    %c0_i32 = arith.constant 0 : i32
    %c0_i32_0 = arith.constant 0 : i32
    return %arg0, %arg1, %c0_i32 : i32, i32, i32
  }
  func.func @transform_2(%arg0: i32, %arg1: i32) -> (i32, i32, i32) {
    %c0_i32 = arith.constant 0 : i32
    %c0_i32_0 = arith.constant 0 : i32
    %c0_i32_1 = arith.constant 0 : i32
    return %arg0, %c0_i32, %c0_i32_0 : i32, i32, i32
  }
  func.func @transform_3(%arg0: i32, %arg1: i32) -> (i32, i32, i32) {
    %c0_i32 = arith.constant 0 : i32
    %c0_i32_0 = arith.constant 0 : i32
    %c0_i32_1 = arith.constant 0 : i32
    %c0_i32_2 = arith.constant 0 : i32
    return %c0_i32, %c0_i32_0, %c0_i32_1 : i32, i32, i32
  }
  func.func @transform_4(%arg0: i32, %arg1: i32) -> (i32, i32) {
    %c0_i32 = arith.constant 0 : i32
    %c0_i32_0 = arith.constant 0 : i32
    %c0_i32_1 = arith.constant 0 : i32
    return %c0_i32, %c0_i32_0 : i32, i32
  }
  func.func @transform_5(%arg0: i32, %arg1: i32) -> (i32, i32, i32) {
    %c0_i32 = arith.constant 0 : i32
    %c0_i32_0 = arith.constant 0 : i32
    return %arg0, %arg1, %c0_i32 : i32, i32, i32
  }
}

</mosaic_0001>

<bundles_post_ra>
// kernel: tpu_custom_call.1
= control target key start
LH: loop header
LB: loop body
LE: loop exit
PB: predicated region body
PF: predicated region fallthrough
CT: control target
= control target key end

     0   :  { %s1246_s0 = inlined_call_operand.vmem [shape: s32[8,2], index: 0, kind: input, shape index: {}]   ;;  %s1247_s1 = inlined_call_operand.hbm [shape: f32[2,8,32], index: 1, kind: input, shape index: {}]   ;;  %s1248_s2 = inlined_call_operand.hbm [shape: f32[2,8,32], index: 2, kind: input, shape index: {}]   ;;  %s1249_s3 = inlined_call_operand.hbm [shape: f32[5,32,32], index: 3, kind: input, shape index: {}]   ;;  %s1250_s4 = inlined_call_operand.vmem [shape: f32[3,32], index: 4, kind: input, shape index: {}]   ;;  %s1251_s5 = inlined_call_operand.hbm [shape: f32[2,8,32], index: 5, kind: output, shape index: {}]  }
   0x1   :  { %1256 = sst [smem:[#allocation18_spill]] %s1249_s3 }
   0x2   :  { %10 = vsyncpa [#allocation3], 0 }
   0x3   :  { %12 = vsyncpa [#allocation3 + $0x1], 0 }
   0x4   :  { %13 = vsyncpa [#allocation6], 0 }
   0x5   :  { %15 = vsyncpa [#allocation6 + $0x1], 0 }
   0x6   :  { %16 = vsyncpa [#allocation4], 0 }
   0x7   :  { %18 = vsyncpa [#allocation4 + $0x1], 0  ;;  %s1069_s18 = smov 0   ;;  %s1071_s19 = smov 0  }
   0x8   :  { %s1073_s20 = smov 0   ;;  %s1075_s21 = smov 0  }
   0x9   :  { %s1077_s22 = smov 0   ;;  %s1079_s23 = smov 0  }
   0xa LB: > { %1257 = sst [smem:[#allocation13_spill]] %s1019_s20  ;;  %s1100_s24 = sadd.s32 4294967295, %s1031_s23   ;;  %s1031_s23 = sphi %s1079_s23, %s24_s23   ;;  %s1027_s22 = sphi %s1077_s22, %s1272_s22   ;;  %s1023_s21 = sphi %s1075_s21, %s1271_s21   ;;  %s1019_s20 = sphi %s1073_s20, %s1270_s20   ;;  %s1015_s19 = sphi %s1071_s19, %s1274_s19   ;;  %s1011_s18 = sphi %s1069_s18, %s1273_s18  }
   0xb   : > { %1258 = sst [smem:[#allocation14_spill]] %s1027_s22  ;;  %p727_p0 = scmp.ge.s32.totalorder %s1031_s23, 1 }
   0xc   : > { %p85_p1 = scmp.eq.s32.totalorder %s1100_s24, 0  ;;  %p191_p2 = scmp.lt.s32.totalorder %s1031_s23, 3 }
   0xd   : > { %s1259_s3 = sld [smem:[#allocation18_spill]]  ;;  %s1033_s29 = smov [#allocation7]  }
   0xe   : > { %p1108_p3 = pnand %p727_p0, %p191_p2  ;;  %s211_s30 = sshll.u32 %s1033_s29, 4  ;;  %s212_s30 = int_to_ptr.vmem [resolvable:$true] %s211_s30 }
   0xf   : > { %p730_p6 = scmp.ge.s32.totalorder %s1031_s23, 2  ;;  %s1034_s6 = smov 128  }
  0x10   : > { %p765_p4 = pneg %p1108_p3  ;;  %s1035_s7 = smov 8  }
  0x11   : > { %s726_s8 = sadd.s32 4294967294, %s1031_s23   ;;  %s36_s9 = sadd.s32 1, %s1027_s22 }
  0x12   : > { %p766_p5 = pnand %p765_p4, %p85_p1  ;;  %s71_s10 = sadd.s32 1, %s1019_s20 }
  0x13   : > { %s209_s27 = sshll.u32 %s1259_s3, 4  ;;  %p38_p7 = scmp.ge.s32.totalorder %s36_s9, 2  ;;  %s210_s27 = int_to_ptr.hbm [resolvable:$true] %s209_s27 }
  0x14   : > { %768 = dma.hbm_to_vmem [thread:$0]  (!%p766_p5), %s210_s27, 2560, %s212_s30, [#allocation6], %s1034_s6, %s1034_s6, %s1035_s7  }
  0x15   : > { %p78_p8 = scmp.ne.s32.totalorder %s1019_s20, %s1015_s19  ;;  %p79_p9 = scmp.eq.s32.totalorder %s1031_s23, 0 }
  0x16   : > { %p84_p10 = scmp.ne.s32.totalorder %s1015_s19, %s1011_s18  ;;  %s1276_s9 = smov (%p38_p7, %s36_s9), 0 }
  0x17   : > { %1261 = sst [smem:[#allocation15_spill]] %s1276_s9  ;;  %p1127_p11 = por %p79_p9, %p78_p8 }
  0x18   : > { %p1133_p12 = por %p85_p1, %p84_p10  ;;  %s66_s13 = ssub.s32 %s1027_s22, %s1276_s9 }
  0x19   : > { %p178_p13 = scmp.eq.s32.totalorder %s1100_s24, 1  ;;  %p69_p0 = scmp.eq.s32.totalorder %s66_s13, 0 }
  0x1a   : > { %p184_p2 = scmp.eq.s32.totalorder %s726_s8, 1  ;;  %p781_p5 = scmp.lt.s32.totalorder %s1031_s23, 2 }
  0x1b   : > { %p1140_p4 = por %p178_p13, %p78_p8  ;;  %s228_s17 = sand.u32 1, %s1019_s20  }
  0x1c   : > { %s1146_s15 = scalar_select %p69_p0, %s1019_s20, %s71_s10  }
  0x1d   : > { %p1148_p7 = por %p184_p2, %p84_p10  ;;  %s731_s25 = sshll.u32 %s228_s17, 3 }
  0x1e   : > { %1265 = sst [smem:[#allocation16_spill]] %s1146_s15  ;;  %s732_s26 = sshll.u32 %s1027_s22, 3 }
  0x1f   : > { %s1266_s16 = scalar_select %p1148_p7, 1, 0 }
  0x20   : > { %s237_s30 = scalar_lea.hbm %s1247_s1, %s732_s26  ;;  %s232_s6 = scalar_lea.vmem [#allocation2], %s731_s25 }
  0x21   : > { %1267 = sst [smem:[#allocation17_spill]] %s1266_s16  ;;  %s241_s7 = sshll.u32 %s232_s6, 4  ;;  %s242_s7 = int_to_ptr.vmem [resolvable:$true] %s241_s7 }
  0x22   : > { %s239_s8 = sshll.u32 %s237_s30, 4  ;;  %p770_p8 = pnand %p781_p5, %p1127_p11  ;;  %s240_s8 = int_to_ptr.hbm [resolvable:$true] %s239_s8 }
  0x23   : > { %s256_s3 = scalar_lea.hbm %s1248_s2, %s732_s26  ;;  %s248_s9 = sand.u32 1, %s1031_s23  }
  0x24   : > { %s229_s15 = scalar_lea.sflag [#allocation3], %s228_s17  ;;  %s258_s20 = sshll.u32 %s256_s3, 4  ;;  %s259_s20 = int_to_ptr.hbm [resolvable:$true] %s258_s20 }
  0x25   : > { %772 = dma.hbm_to_vmem [thread:$0]  (!%p770_p8), %s240_s8, 128, %s242_s7, %s229_s15  }
  0x26   : > { %s252_s22 = scalar_lea.vmem [#allocation5], %s731_s25  ;;  %s249_s27 = scalar_lea.sflag [#allocation6], %s248_s9 }
  0x27   : > { %s260_s16 = sshll.u32 %s252_s22, 4  ;;  %269 = sbr.rel (%p1108_p3) target bundleno = 648 (0x288), region = 40  ;;  %s261_s16 = int_to_ptr.vmem [resolvable:$true] %s260_s16 }
  0x28   : > { %775 = dma.hbm_to_vmem [thread:$0]  (!%p770_p8), %s259_s20, 128, %s261_s16, %s249_s27  }
  0x29   : > { %s1166_s11 = sand.u32 (!%p1108_p3), 1, %s1015_s19  }
  0x2a   : > { %s1169_s26 = sshll.u32 (!%p1108_p3), %s1166_s11, 3  ;;  %s272_s15 = scalar_lea.sflag (!%p1108_p3), [#allocation3], %s1166_s11 }
  0x2b   : > { %s275_s3 = scalar_lea.vmem (!%p1108_p3), [#allocation2], %s1169_s26 }
  0x2c   : > { %994 = dma.done.wait (%p1133_p12), %s272_s15, 128  }
  0x2d   : > { %996 = vsyncadd (%p1133_p12), %s272_s15, 4294967168  ;;  %s281_s20 = sand.u32 1, %s1100_s24   ;;  %s285_s28 = scalar_lea.vmem [#allocation5], %s1169_s26 }
  0x2e   : > { %s282_s22 = scalar_lea.sflag [#allocation6], %s281_s20 }
  0x2f   : > { %998 = dma.done.wait (%p1133_p12), %s282_s22, 128  }
  0x30   : > { %1000 = vsyncadd (%p1133_p12), %s282_s22, 4294967168 }
  0x31   : > { %1002 = dma.done.wait (%p85_p1), [#allocation6], 2560  }
  0x32   : > { %1004 = vsyncadd (%p85_p1), [#allocation6], 4294964736  ;;  %v1036_v0 = vmov 0   ;;  %v337_v1 = vld [vmem:[#allocation7 + $0x38] sm:$0xff]  ;;  %v336_v3 = vld [vmem:[#allocation7 + $0x30] sm:$0xff]  ;;  %vm338_vm0 = vcmask 261120   ;;  %v388_v17 = vlaneseq }
  0x33   : > { %838 = vset.pattern.permute.xlu0 %v1036_v0  ;;  %v366_v2 = vld [vmem:[#allocation7 + $0x58] sm:$0xff]  ;;  %354 = vmatpush.msra.mxu0 %v337_v1  ;;  %v365_v4 = vld [vmem:[#allocation7 + $0x50] sm:$0xff]  ;;  %v335_v5 = vld [vmem:[#allocation7 + $0x28] sm:$0xff]  ;;  %v1037_v13 = vmov 1   ;;  %v1038_v20 = vmov 0.0   ;;  %vm406_vm2 = vcmask 64512  }
  0x34   : > { %379 = vmatpush.msra.mxu1 %v366_v2  ;;  %v364_v6 = vld [vmem:[#allocation7 + $0x48] sm:$0xff]  ;;  %v334_v7 = vld [vmem:[#allocation7 + $0x20] sm:$0xff]  ;;  %v405_v10 = vld [vmem:[#allocation7 + $0x18] sm:$0xff]  ;;  %v389_v19 = vand.u32 127, %v388_v17  ;;  %s752_s29 = sshll.u32 %s1023_s21, 3  ;;  %s326_s13 = scalar_lea.vmem [#allocation8], %s1169_s26 }
  0x35   : > { %v363_v8 = vld [vmem:[#allocation7 + $0x40] sm:$0xff]  ;;  %355 = vmatpush.msra.mxu0 %v336_v3  ;;  %v404_v11 = vld [vmem:[#allocation7 + $0x10] sm:$0xff]  ;;  %445 = vmatpush.msra.mxu3 %v405_v10  ;;  %v403_v14 = vld [vmem:[#allocation7 + $0x8] sm:$0xff]  ;;  %s593_s7 = scalar_lea.hbm %s1251_s5, %s752_s29  ;;  %s595_s27 = sshll.u32 %s326_s13, 4  ;;  %s596_s27 = int_to_ptr.vmem [resolvable:$true] %s595_s27 }
  0x36   : > { %380 = vmatpush.msra.mxu1 %v365_v4  ;;  %v387_v9 = vld [vmem:[%s1246_s0] sm:$0xff]  ;;  %v332_v12 = vld [vmem:[%s285_s28] sm:$0xff]  ;;  %v502_v32 = vld [vmem:[#allocation7 + $0x68] sm:$0xff]  ;;  %s597_s15 = sshll.u32 %s593_s7, 4  ;;  %s961_s26 = scalar_lea.hbm %s1251_s5, 16  ;;  %s598_s15 = int_to_ptr.hbm [resolvable:$true] %s597_s15 }
  0x37   : > { %391 = vperm.xlu0 %838, %v387_v9   ;;  %356 = vmatpush.msra.mxu0 %v335_v5  ;;  %v402_v15 = vld [vmem:[#allocation7] sm:$0xff]  ;;  %v504_v27 = vld [vmem:[#allocation7 + $0x78] sm:$0xff]  ;;  %v503_v29 = vld [vmem:[#allocation7 + $0x70] sm:$0xff]  ;;  %s955_s21 = sshra.s32 %s598_s15, 4  ;;  %s956_s21 = int_to_ptr.hbm [resolvable:$true] %s955_s21 }
  0x38   : > { %381 = vmatpush.msra.mxu1 %v364_v6  ;;  %446 = vmatpush.msra.mxu3 %v404_v11  ;;  %v331_v16 = vld [vmem:[%s275_s3] sm:$0xff]  ;;  %v554_v51 = vld [vmem:[#allocation7 + $0x98] sm:$0xff]  ;;  %v553_v52 = vld [vmem:[#allocation7 + $0x90] sm:$0xff]  ;;  %s582_s3 = scalar_lea.sflag [#allocation4], %s1166_s11  ;;  %s957_s20 = scalar_lea.hbm %s956_s21, 8 }
  0x39   : > { %357 = vmatpush.msra.mxu0 %v334_v7  ;;  %v840_v31 = vld [vmem:[%s1250_s4] ss:$0 sm:$0xff]  ;;  %v841_v53 = vld [vmem:[%s1250_s4 + $0x1] ss:$0 sm:$0xff]  ;;  %v552_v54 = vld [vmem:[#allocation7 + $0x88] sm:$0xff]  ;;  %p958_p1 = scmp.ne.s32.totalorder %s956_s21, %s957_s20  ;;  %p962_p10 = scmp.lt.s32.totalorder %s956_s21, %s1251_s5 }
  0x3a   : > { %382 = vmatpush.msra.mxu1 %v363_v8  ;;  %740 = vmatmul.msk.f32.vlgmr.msra.gmra.mxu0 %vm338_vm0, %v332_v12  ;;  %v501_v35 = vld [vmem:[#allocation7 + $0x60] sm:$0xff]  ;;  %p963_p11 = scmp.lt.s32.totalorder %s961_s26, %s957_s20 }
  0x3b   : > { %741 = vmatmul.msk.f32.vlgmr.msra.gmra.mxu1 %vm338_vm0, %v332_v12  ;;  %447 = vmatpush.msra.mxu3 %v403_v14  ;;  %v551_v55 = vld [vmem:[#allocation7 + $0x80] sm:$0xff]  ;;  %p959_p3 = pnand %p958_p1, %p1140_p4 }
  0x3c   : > { %522 = vmatpush.msrb.mxu0 %v504_v27  ;;  %572 = vmatpush.msrb.mxu1 %v554_v51  ;;  %v842_v8 = vld [vmem:[%s1250_s4 + $0x2] ss:$0 sm:$0xff]  ;;  %p964_p12 = por %p963_p11, %p962_p10 }
  0x3d   : > { %448 = vmatpush.msra.mxu3 %v402_v15  ;;  %p960_p9 = pneg %p959_p3 }
  0x3e   : > { %745 = vmatmul.msk.f32.vlgmr.msra.gmra.mxu3 %vm338_vm0, %v331_v16  ;;  %523 = vmatpush.msrb.mxu0 %v503_v29 }
  0x3f   : > { %839 = vset.pattern.permute.xlu0 %v1037_v13  ;;  %573 = vmatpush.msrb.mxu1 %v553_v52  ;;  %p965_p13 = pnand %p964_p12, %p960_p9 }
  0x40   : > { %397 = vperm.xlu0 %839, %v387_v9   ;;  %524 = vmatpush.msrb.mxu0 %v502_v32 }
  0x41   : > { %574 = vmatpush.msrb.mxu1 %v552_v54 }
  0x42   : > { %525 = vmatpush.msrb.mxu0 %v501_v35 }
  0x43   : > { %575 = vmatpush.msrb.mxu1 %v551_v55 }
  0xa9   : > { %v392_v18 = vpop.permute.xlu0 %391 }
  0xaa   : > { %vm393_vm1 = vcmp.eq.s32.totalorder %v389_v19, %v392_v18 }
  0xab   : > { %v742_v21 = vsel %vm393_vm1, 1.0, %v1038_v20 }
  0xb2   : > { %v398_v24 = vpop.permute.xlu0 %397 }
  0xb3   : > { %vm399_vm3 = vcmp.eq.s32.totalorder %v389_v19, %v398_v24 }
  0xb4   : > { %v743_v25 = vsel %vm399_vm3, 1.0, %v1038_v20 }
  0xb7   : > { %v359_v22 = vpop.f32.mrf.mxu0 }
  0xb8   : > { %v384_v23 = vpop.f32.mrf.mxu1  ;;  %425 = vmatpush.msra.mxu2 %v359_v22 }
  0xb9   : > { %744 = vmatmul.msk.f32.vlgmr.msra.gmra.mxu2 %vm406_vm2, %v742_v21 }
  0xba   : > { %471 = vmatpush.msrb.mxu2 %v384_v23 }
  0xc1   : > { %746 = vmatmul.msk.f32.vlgmr.msrb.gmra.mxu2 %vm406_vm2, %v743_v25  ;;  %v450_v28 = vpop.f32.mrf.mxu3 }
 0x13c   : > { %v427_v26 = vpop.f32.mrf.mxu2 }
 0x13d   : > { %v451_v30 = vadd.f32 %v450_v28, %v427_v26 }
 0x144   : > { %v473_v33 = vpop.f32.mrf.mxu2 }
 0x145   : > { %v476_v34 = vadd.f32 %v473_v33, %v451_v30 }
 0x147   : > { %v479_v36 = vadd.f32 %v840_v31, %v476_v34 }
 0x149   : > { %v747_v37 = vmul.f32 -1.442695, %v479_v36 }
 0x14b   : > { %843 = vpow2.f32 %v747_v37 }
 0x151   : > { %v844_v38 = vpop.eup %843 }
 0x152   : > { %v483_v39 = vadd.f32 1.0, %v844_v38 }
 0x154   : > { %845 = vrcp.f32 %v483_v39  ;;  %v495_v43 = vand.u32 2147483648, %v483_v39  ;;  %v493_v45 = vand.u32 2147483647, %v483_v39  ;;  %vm489_vm5 = vweird.f32 %v483_v39 }
 0x156   : > { %v496_v47 = vor.u32 1.1754944e-38, %v495_v43  ;;  %vm494_vm7 = vcmp.eq.f32.partialorder %v493_v45, 8.507059e+37 }
 0x15a   : > { %v846_v40 = vpop.eup %845 }
 0x15b   : > { %v485_v41 = vmul.f32 %v846_v40, %v483_v39  ;;  %vm490_vm4 = vweird.f32 %v846_v40 }
 0x15c   : > { %vm491_vm6 = vmor %vm489_vm5, %vm490_vm4 }
 0x15d   : > { %v486_v42 = vsub.f32 1.0, %v485_v41 }
 0x15f   : > { %v487_v44 = vmul.f32 %v846_v40, %v486_v42 }
 0x161   : > { %v488_v46 = vadd.f32 %v846_v40, %v487_v44 }
 0x163   : > { %v492_v48 = vsel %vm491_vm6, %v846_v40, %v488_v46 }
 0x164   : > { %v497_v49 = vsel %vm494_vm7, %v496_v47, %v492_v48 }
 0x165   : > { %v499_v50 = vmul.f32 %v497_v49, %v479_v36 }
 0x167   : > { %748 = vmatmul.msk.f32.vlgmr.msrb.gmra.mxu0 %vm338_vm0, %v499_v50 }
 0x1e4   : > { %v527_v56 = vpop.f32.mrf.mxu0 }
 0x1e5   : > { %v528_v57 = vadd.f32 %v841_v53, %v527_v56 }
 0x1e7   : > { %v749_v58 = vmul.f32 -1.442695, %v528_v57 }
 0x1e9   : > { %847 = vpow2.f32 %v749_v58 }
 0x1ef   : > { %v848_v59 = vpop.eup %847 }
 0x1f0   : > { %v533_v60 = vadd.f32 1.0, %v848_v59 }
 0x1f2   : > { %849 = vrcp.f32 %v533_v60  ;;  %v545_v0 = vand.u32 2147483648, %v533_v60  ;;  %v543_v2 = vand.u32 2147483647, %v533_v60  ;;  %vm539_vm9 = vweird.f32 %v533_v60 }
 0x1f4   : > { %v546_v4 = vor.u32 1.1754944e-38, %v545_v0  ;;  %vm544_vm11 = vcmp.eq.f32.partialorder %v543_v2, 8.507059e+37 }
 0x1f8   : > { %v850_v61 = vpop.eup %849 }
 0x1f9   : > { %v535_v62 = vmul.f32 %v850_v61, %v533_v60  ;;  %vm540_vm8 = vweird.f32 %v850_v61 }
 0x1fa   : > { %vm541_vm10 = vmor %vm539_vm9, %vm540_vm8 }
 0x1fb   : > { %v536_v63 = vsub.f32 1.0, %v535_v62 }
 0x1fd   : > { %v537_v1 = vmul.f32 %v850_v61, %v536_v63 }
 0x1ff   : > { %v538_v3 = vadd.f32 %v850_v61, %v537_v1 }
 0x201   : > { %v542_v5 = vsel %vm541_vm10, %v850_v61, %v538_v3 }
 0x202   : > { %v547_v6 = vsel %vm544_vm11, %v546_v4, %v542_v5 }
 0x203   : > { %v549_v7 = vmul.f32 %v547_v6, %v528_v57 }
 0x205   : > { %750 = vmatmul.msk.f32.vlgmr.msrb.gmra.mxu1 %vm338_vm0, %v549_v7 }
 0x282   : > { %v577_v9 = vpop.f32.mrf.mxu1 }
 0x283   : > { %v578_v10 = vadd.f32 %v842_v8, %v577_v9 }
 0x285   : > { %580 = vst.msk [vmem:[%s326_s13] sm:$0xff] %vm338_vm0, %v578_v10 }
 0x286   : > { %968 = shalt.err (!%p965_p13)
}
 0x287   : > { %763 = dma.vmem_to_hbm [thread:$0]  (%p1140_p4), %s596_s27, 128, %s598_s15, %s582_s3  }
 0x288 PF: > { %s609_s24 = sand.u32 1, %s1011_s18   ;;  %p777_p0 = pnand %p730_p6, %p1148_p7 }
 0x289   : > { %s610_s16 = scalar_lea.sflag [#allocation4], %s609_s24 }
 0x28a   : > { %p778_p2 = pneg %p777_p0 }
 0x28c   : > { %1006 = dma.done.wait (%p778_p2), %s610_s16, 128  }
 0x28d   : > { %1008 = vsyncadd (%p778_p2), %s610_s16, 4294967168  ;;  %s24_s23 = sadd.s32 1, %s1031_s23   ;;  %s1269_s17 = sld [smem:[#allocation13_spill]] }
 0x28e   : > { %p21_p5 = scmp.ge.s32.totalorder %s24_s23, 4   ;;  %s1270_s20 = sld [smem:[#allocation16_spill]] }
 0x28f   : > { %s1271_s21 = sld [smem:[#allocation14_spill]]  ;;  %s1273_s18 = smov %s1015_s19 }
 0x290   : > { %s1272_s22 = sld [smem:[#allocation15_spill]]  ;;  %23 = sbr.rel (!%p21_p5) target bundleno = 10 (0xa), region = 109 }
 0x293   : > { %s1274_s19 = smov %s1269_s17 }
 0x295   :  { %616 = vsyncpa [#allocation3], 1 }
 0x296   :  { %618 = vsyncpa [#allocation3 + $0x1], 1 }
 0x297   :  { %619 = vsyncpa [#allocation6], 1 }
 0x298   :  { %621 = vsyncpa [#allocation6 + $0x1], 1 }
 0x299   :  { %622 = vsyncpa [#allocation4], 1 }
 0x29a   :  { %624 = vsyncpa [#allocation4 + $0x1], 1 }

</bundles_post_ra>
